<compile_context>
chip_gen: v7x
topology: tpu7x:2x2x1
jax: 0.10.0
libtpu: 0.0.40
codegen_flags: <defaults>
</compile_context>

<pallas_src>
import jax
import jax.numpy as jnp
from jax.experimental import pallas as pl
from jax.experimental.pallas import tpu as pltpu


def policy_kernel(x_ref, p_ref, out_ref):
    # x:   (B, 4) f32
    # p:   (8, 128) f32 slab:
    #        rows 0..3 -> w1 (in, out) layout
    #        row  4    -> b1
    #        rows 5..6 -> w2^T (row j = w2[:, j])
    #        row  7    -> b2 in lanes 0..1 (rest zero)
    # out: (B, 2) f32
    x = x_ref[...]                                   # (B, 4)

    # ---- fc1 + ReLU on the VPU (no MXU push/drain) ----
    h = (p_ref[4:5, :]                               # b1 broadcast (1,128)
         + x[:, 0:1] * p_ref[0:1, :]
         + x[:, 1:2] * p_ref[1:2, :]
         + x[:, 2:3] * p_ref[2:3, :]
         + x[:, 3:4] * p_ref[3:4, :])                # (B, 128)
    h = jnp.maximum(h, 0.0)

    # ---- fc2 via XLU lane reductions ----
    s0 = jnp.sum(h * p_ref[5:6, :], axis=-1, keepdims=True) + p_ref[7:8, 0:1]  # (B,1)
    s1 = jnp.sum(h * p_ref[6:7, :], axis=-1, keepdims=True) + p_ref[7:8, 1:2]  # (B,1)

    # ---- softmax over dim=0 (batch axis), exactly F.softmax(..., dim=0) ----
    # Each output column normalizes independently over the batch.
    def _softmax_dim0(s):
        m = jnp.max(s, axis=0, keepdims=True)
        e = jnp.exp(s - m)
        return e * pl.reciprocal(jnp.sum(e, axis=0, keepdims=True), approx=True)

    out_ref[:, 0:1] = _softmax_dim0(s0)
    out_ref[:, 1:2] = _softmax_dim0(s1)


def pack_params(w1, b1, w2, b2):
    """Pack fc1/fc2 params into a single (8, 128) f32 slab (one vreg tile).

    w1: (4, 128)  b1: (1, 128)  w2: (128, 2)  b2: (1, 2)
    """
    b2_row = jnp.zeros((1, 128), jnp.float32).at[0, :2].set(b2.reshape(-1))
    return jnp.concatenate(
        [w1.astype(jnp.float32),
         b1.reshape(1, 128).astype(jnp.float32),
         w2.T.astype(jnp.float32),
         b2_row],
        axis=0)                                      # (8, 128)


def policy_forward(x, params):
    B = x.shape[0]
    vmem = pl.BlockSpec(memory_space=pltpu.MemorySpace.VMEM)
    return pl.pallas_call(
        policy_kernel,
        out_shape=jax.ShapeDtypeStruct((B, 2), jnp.float32),
        in_specs=[vmem, vmem],
        out_specs=vmem,
    )(x, params)


def policy_forward_ref(x, w1, b1, w2, b2):
    h = jnp.maximum(x @ w1 + b1, 0.0)
    logits = h @ w2 + b2
    return jax.nn.softmax(logits, axis=0)


if __name__ == "__main__":
    key = jax.random.PRNGKey(0)
    k_x, k_w1, k_b1, k_w2, k_b2 = jax.random.split(key, 5)

    B, IN, HID, OUT = 8, 4, 128, 2

    # Deterministic synthetic parameters (shapes from nn.Linear(4,128)/(128,2)).
    # PyTorch stores weight as (out, in); we keep them as (in, out) for x @ W.
    x = jax.random.normal(k_x, (B, IN), dtype=jnp.float32)
    w1 = jax.random.uniform(k_w1, (IN, HID), minval=-0.5, maxval=0.5, dtype=jnp.float32)
    b1 = jax.random.uniform(k_b1, (1, HID), minval=-0.5, maxval=0.5, dtype=jnp.float32)
    w2 = jax.random.uniform(k_w2, (HID, OUT), minval=-0.1, maxval=0.1, dtype=jnp.float32)
    b2 = jax.random.uniform(k_b2, (1, OUT), minval=-0.1, maxval=0.1, dtype=jnp.float32)

    params = pack_params(w1, b1, w2, b2)             # pack once, reuse per step

    out = jax.block_until_ready(policy_forward(x, params))
    ref = jax.block_until_ready(policy_forward_ref(x, w1, b1, w2, b2))

    assert out.shape == (B, OUT)
    # approx=True reciprocal on the EUP -> relax tolerance from 1e-5 to ~3e-3.
    assert jnp.allclose(out, ref, atol=3e-3, rtol=3e-3), "mismatch vs reference"
    # each column sums to ~1 (softmax over dim=0)
    assert jnp.allclose(jnp.sum(out, axis=0), jnp.ones((OUT,)), atol=3e-3)

    print("KERNEL_OK")
</pallas_src>

<mosaic_0001>
module attributes {stable_mosaic.version = 11 : i64} {
  func.func @policy_kernel(%arg0: memref<8x4xf32, #tpu.memory_space<vmem>>, %arg1: memref<8x128xf32, #tpu.memory_space<vmem>>, %arg2: memref<8x2xf32, #tpu.memory_space<vmem>>) attributes {dimension_semantics = [], scalar_prefetch = 0 : i64, scratch_operands = 0 : i64, tpu.core_type = #tpu.core_type<tc>} {
    %c0 = arith.constant 0 : index
    %c0_0 = arith.constant 0 : index
    %0 = vector.load %arg0[%c0, %c0_0] : memref<8x4xf32, #tpu.memory_space<vmem>>, vector<8x4xf32>
    %c4 = arith.constant 4 : index
    %c0_1 = arith.constant 0 : index
    %1 = vector.load %arg1[%c4, %c0_1] : memref<8x128xf32, #tpu.memory_space<vmem>>, vector<1x128xf32>
    %2 = vector.extract_strided_slice %0 {offsets = [0, 0], sizes = [8, 1], strides = [1, 1]} : vector<8x4xf32> to vector<8x1xf32>
    %c0_2 = arith.constant 0 : index
    %c0_3 = arith.constant 0 : index
    %3 = vector.load %arg1[%c0_2, %c0_3] : memref<8x128xf32, #tpu.memory_space<vmem>>, vector<1x128xf32>
    %4 = vector.broadcast %2 : vector<8x1xf32> to vector<8x128xf32>
    %5 = vector.broadcast %3 : vector<1x128xf32> to vector<8x128xf32>
    %6 = arith.mulf %4, %5 : vector<8x128xf32>
    %7 = vector.broadcast %1 : vector<1x128xf32> to vector<8x128xf32>
    %8 = arith.addf %7, %6 : vector<8x128xf32>
    %9 = vector.extract_strided_slice %0 {offsets = [0, 1], sizes = [8, 1], strides = [1, 1]} : vector<8x4xf32> to vector<8x1xf32>
    %c1 = arith.constant 1 : index
    %c0_4 = arith.constant 0 : index
    %10 = vector.load %arg1[%c1, %c0_4] : memref<8x128xf32, #tpu.memory_space<vmem>>, vector<1x128xf32>
    %11 = vector.broadcast %9 : vector<8x1xf32> to vector<8x128xf32>
    %12 = vector.broadcast %10 : vector<1x128xf32> to vector<8x128xf32>
    %13 = arith.mulf %11, %12 : vector<8x128xf32>
    %14 = arith.addf %8, %13 : vector<8x128xf32>
    %15 = vector.extract_strided_slice %0 {offsets = [0, 2], sizes = [8, 1], strides = [1, 1]} : vector<8x4xf32> to vector<8x1xf32>
    %c2 = arith.constant 2 : index
    %c0_5 = arith.constant 0 : index
    %16 = vector.load %arg1[%c2, %c0_5] : memref<8x128xf32, #tpu.memory_space<vmem>>, vector<1x128xf32>
    %17 = vector.broadcast %15 : vector<8x1xf32> to vector<8x128xf32>
    %18 = vector.broadcast %16 : vector<1x128xf32> to vector<8x128xf32>
    %19 = arith.mulf %17, %18 : vector<8x128xf32>
    %20 = arith.addf %14, %19 : vector<8x128xf32>
    %21 = vector.extract_strided_slice %0 {offsets = [0, 3], sizes = [8, 1], strides = [1, 1]} : vector<8x4xf32> to vector<8x1xf32>
    %c3 = arith.constant 3 : index
    %c0_6 = arith.constant 0 : index
    %22 = vector.load %arg1[%c3, %c0_6] : memref<8x128xf32, #tpu.memory_space<vmem>>, vector<1x128xf32>
    %23 = vector.broadcast %21 : vector<8x1xf32> to vector<8x128xf32>
    %24 = vector.broadcast %22 : vector<1x128xf32> to vector<8x128xf32>
    %25 = arith.mulf %23, %24 : vector<8x128xf32>
    %26 = arith.addf %20, %25 : vector<8x128xf32>
    %cst = arith.constant 0.000000e+00 : f32
    %27 = vector.broadcast %cst : f32 to vector<8x128xf32>
    %28 = arith.maximumf %26, %27 : vector<8x128xf32>
    %c5 = arith.constant 5 : index
    %c0_7 = arith.constant 0 : index
    %29 = vector.load %arg1[%c5, %c0_7] : memref<8x128xf32, #tpu.memory_space<vmem>>, vector<1x128xf32>
    %30 = vector.broadcast %29 : vector<1x128xf32> to vector<8x128xf32>
    %31 = arith.mulf %28, %30 : vector<8x128xf32>
    %cst_8 = arith.constant dense<0.000000e+00> : vector<8xf32>
    %32 = vector.multi_reduction <add>, %31, %cst_8 [1] : vector<8x128xf32> to vector<8xf32>
    %33 = vector.shape_cast %32 : vector<8xf32> to vector<8x1xf32>
    %c7 = arith.constant 7 : index
    %c0_9 = arith.constant 0 : index
    %34 = vector.load %arg1[%c7, %c0_9] : memref<8x128xf32, #tpu.memory_space<vmem>>, vector<1x1xf32>
    %35 = vector.broadcast %34 : vector<1x1xf32> to vector<8x1xf32>
    %36 = arith.addf %33, %35 : vector<8x1xf32>
    %c6 = arith.constant 6 : index
    %c0_10 = arith.constant 0 : index
    %37 = vector.load %arg1[%c6, %c0_10] : memref<8x128xf32, #tpu.memory_space<vmem>>, vector<1x128xf32>
    %38 = vector.broadcast %37 : vector<1x128xf32> to vector<8x128xf32>
    %39 = arith.mulf %28, %38 : vector<8x128xf32>
    %cst_11 = arith.constant dense<0.000000e+00> : vector<8xf32>
    %40 = vector.multi_reduction <add>, %39, %cst_11 [1] : vector<8x128xf32> to vector<8xf32>
    %41 = vector.shape_cast %40 : vector<8xf32> to vector<8x1xf32>
    %c7_12 = arith.constant 7 : index
    %c1_13 = arith.constant 1 : index
    %42 = vector.load %arg1[%c7_12, %c1_13] : memref<8x128xf32, #tpu.memory_space<vmem>>, vector<1x1xf32>
    %43 = vector.broadcast %42 : vector<1x1xf32> to vector<8x1xf32>
    %44 = arith.addf %41, %43 : vector<8x1xf32>
    %cst_14 = arith.constant dense<0xFF800000> : vector<1xf32>
    %45 = vector.multi_reduction <maximumf>, %36, %cst_14 [0] : vector<8x1xf32> to vector<1xf32>
    %46 = vector.shape_cast %45 : vector<1xf32> to vector<1x1xf32>
    %47 = vector.broadcast %46 : vector<1x1xf32> to vector<8x1xf32>
    %48 = arith.subf %36, %47 : vector<8x1xf32>
    %49 = math.exp %48 : vector<8x1xf32>
    %cst_15 = arith.constant dense<0.000000e+00> : vector<1xf32>
    %50 = vector.multi_reduction <add>, %49, %cst_15 [0] : vector<8x1xf32> to vector<1xf32>
    %51 = vector.shape_cast %50 : vector<1xf32> to vector<1x1xf32>
    %52 = tpu.reciprocal %51 {approx = true} : vector<1x1xf32> -> vector<1x1xf32>
    %53 = vector.broadcast %52 : vector<1x1xf32> to vector<8x1xf32>
    %54 = arith.mulf %49, %53 : vector<8x1xf32>
    %c0_16 = arith.constant 0 : index
    %c0_17 = arith.constant 0 : index
    %55 = vector.load %arg2[%c0_16, %c0_17] : memref<8x2xf32, #tpu.memory_space<vmem>>, vector<8x1xf32>
    tpu.vector_store %arg2[%c0_16, %c0_17], %54 {strides = array<i32>} : memref<8x2xf32, #tpu.memory_space<vmem>>, vector<8x1xf32>,
    %cst_18 = arith.constant dense<0xFF800000> : vector<1xf32>
    %56 = vector.multi_reduction <maximumf>, %44, %cst_18 [0] : vector<8x1xf32> to vector<1xf32>
    %57 = vector.shape_cast %56 : vector<1xf32> to vector<1x1xf32>
    %58 = vector.broadcast %57 : vector<1x1xf32> to vector<8x1xf32>
    %59 = arith.subf %44, %58 : vector<8x1xf32>
    %60 = math.exp %59 : vector<8x1xf32>
    %cst_19 = arith.constant dense<0.000000e+00> : vector<1xf32>
    %61 = vector.multi_reduction <add>, %60, %cst_19 [0] : vector<8x1xf32> to vector<1xf32>
    %62 = vector.shape_cast %61 : vector<1xf32> to vector<1x1xf32>
    %63 = tpu.reciprocal %62 {approx = true} : vector<1x1xf32> -> vector<1x1xf32>
    %64 = vector.broadcast %63 : vector<1x1xf32> to vector<8x1xf32>
    %65 = arith.mulf %60, %64 : vector<8x1xf32>
    %c0_20 = arith.constant 0 : index
    %c1_21 = arith.constant 1 : index
    %66 = vector.load %arg2[%c0_20, %c1_21] : memref<8x2xf32, #tpu.memory_space<vmem>>, vector<8x1xf32>
    tpu.vector_store %arg2[%c0_20, %c1_21], %65 {strides = array<i32>} : memref<8x2xf32, #tpu.memory_space<vmem>>, vector<8x1xf32>,
    return
  }
}

</mosaic_0001>

<bundles_post_ra>
// kernel: tpu_custom_call.1
= control target key start
LH: loop header
LB: loop body
LE: loop exit
PB: predicated region body
PF: predicated region fallthrough
CT: control target
= control target key end

     0   :  { %v157_v0 = vmov 0   ;;  %v158_v2 = vmov 2   ;;  %v159_v3 = vmov 1   ;;  %v160_v4 = vmov 3   ;;  %s215_s0 = inlined_call_operand.vmem [shape: f32[8,4], index: 0, kind: input, shape index: {}]   ;;  %s216_s1 = inlined_call_operand.vmem [shape: f32[8,128], index: 1, kind: input, shape index: {}]   ;;  %s217_s2 = inlined_call_operand.vmem [shape: f32[8,2], index: 2, kind: output, shape index: {}]  }
   0x1   :  { %144 = vset.pattern.permute.xlu0 %v157_v0  ;;  %v11_v1 = vld [vmem:[%s215_s0] sm:$0xff]  ;;  %146 = vset.pattern.permute.xlu1 %v158_v2  ;;  %vm107_vm0 = vcmask 15368   ;;  %vm86_vm1 = vcmask 7168  }
   0x2   :  { %16 = vperm.xlu0 %144, %v11_v1   ;;  %42 = vperm.xlu1 %146, %v11_v1   ;;  %v132_v5 = vld [vmem:[%s216_s1] ss:$0 sm:$0xff]  ;;  %v133_v9 = vld [vmem:[%s216_s1 + $0x4] ss:$0 sm:$0xff]  ;;  %v134_v10 = vld [vmem:[%s216_s1 + $0x1] ss:$0 sm:$0xff] }
   0x3   :  { %v135_v11 = vld [vmem:[%s216_s1 + $0x2] ss:$0 sm:$0xff]  ;;  %v136_v13 = vld [vmem:[%s216_s1 + $0x3] ss:$0 sm:$0xff]  ;;  %v139_v22 = vld [vmem:[%s216_s1 + $0x6] ss:$0 sm:$0xff] }
   0x4   :  { %v137_v23 = vld [vmem:[%s216_s1 + $0x5] ss:$0 sm:$0xff]  ;;  %v138_v27 = vld [vmem:[%s216_s1 + $0x7] ss:$0 sm:$0xff] }
   0x6   :  { %145 = vset.pattern.permute.xlu0 %v159_v3  ;;  %147 = vset.pattern.permute.xlu1 %v160_v4 }
   0x7   :  { %31 = vperm.xlu0 %145, %v11_v1   ;;  %53 = vperm.xlu1 %147, %v11_v1  }
   0xb   :  { %148 = vset.pattern.permute.xlu0 %v160_v4 }
  0x81   :  { %v17_v6 = vpop.permute.xlu0 %16  ;;  %v43_v7 = vpop.permute.xlu1 %42 }
  0x82   :  { %v23_v8 = vmul.f32 %v132_v5, %v17_v6  ;;  %v49_v17 = vmul.f32 %v135_v11, %v43_v7 }
  0x84   :  { %v28_v15 = vadd.f32 %v133_v9, %v23_v8 }
  0x86   :  { %v32_v12 = vpop.permute.xlu0 %31  ;;  %v54_v14 = vpop.permute.xlu1 %53 }
  0x87   :  { %v38_v16 = vmul.f32 %v134_v10, %v32_v12  ;;  %v60_v19 = vmul.f32 %v136_v13, %v54_v14 }
  0x89   :  { %v39_v18 = vadd.f32 %v38_v16, %v28_v15 }
  0x8b   :  { %v50_v20 = vadd.f32 %v49_v17, %v39_v18 }
  0x8d   :  { %v61_v21 = vadd.f32 %v60_v19, %v50_v20 }
  0x8f   :  { %v62_v24 = vmax.f32 %v61_v21, 0.0 }
  0x91   :  { %v82_v25 = vmul.f32 %v139_v22, %v62_v24  ;;  %v68_v26 = vmul.f32 %v137_v23, %v62_v24 }
  0x93   :  { %83 = vadd.xlane.f32.xlu0 %v82_v25  ;;  %69 = vadd.xlane.f32.xlu1 %v68_v26 }
 0x120   :  { %v84_v28 = vpop.xlane.xlu0 %83  ;;  %v70_v29 = vpop.xlane.xlu1 %69 }
 0x121   :  { %v85_v30 = vadd.f32 %v138_v27, %v84_v28  ;;  %v76_v31 = vadd.f32 %v138_v27, %v70_v29 }
 0x123   :  { %v108_v32 = vsel %vm107_vm0, %v85_v30, -inf  ;;  %v87_v33 = vsel %vm86_vm1, %v76_v31, -inf }
 0x124   :  { %v109_v34 = vrot.slane %v108_v32, 4  ;;  %v88_v35 = vrot.slane %v87_v33, 4 }
 0x126   :  { %v110_v36 = vmax.f32 %v108_v32, %v109_v34  ;;  %v89_v37 = vmax.f32 %v87_v33, %v88_v35 }
 0x128   :  { %v111_v38 = vrot.slane %v110_v36, 2  ;;  %v90_v39 = vrot.slane %v89_v37, 2 }
 0x12a   :  { %v112_v40 = vmax.f32 %v110_v36, %v111_v38  ;;  %v91_v41 = vmax.f32 %v89_v37, %v90_v39 }
 0x12c   :  { %v113_v42 = vrot.slane %v112_v40, 1  ;;  %v92_v43 = vrot.slane %v91_v41, 1 }
 0x12e   :  { %v114_v44 = vmax.f32 %v112_v40, %v113_v42  ;;  %v93_v45 = vmax.f32 %v91_v41, %v92_v43 }
 0x130   :  { %v115_v46 = vsub.f32 %v85_v30, %v114_v44  ;;  %v94_v47 = vsub.f32 %v76_v31, %v93_v45 }
 0x132   :  { %v116_v48 = vmul.f32 1.442695, %v115_v46  ;;  %v95_v49 = vmul.f32 1.442695, %v94_v47 }
 0x134   :  { %149 = vpow2.f32 %v116_v48 }
 0x135   :  { %151 = vpow2.f32 %v95_v49 }
 0x13e   :  { %v150_v50 = vpop.eup %149 }
 0x13f   :  { %v152_v51 = vpop.eup %151  ;;  %v118_v52 = vsel %vm107_vm0, %v150_v50, 0.0 }
 0x140   :  { %v119_v53 = vrot.slane %v118_v52, 4  ;;  %v97_v54 = vsel %vm86_vm1, %v152_v51, 0.0 }
 0x141   :  { %v98_v55 = vrot.slane %v97_v54, 4 }
 0x142   :  { %v120_v56 = vadd.f32 %v119_v53, %v118_v52 }
 0x143   :  { %v99_v57 = vadd.f32 %v98_v55, %v97_v54 }
 0x144   :  { %v121_v58 = vrot.slane %v120_v56, 2 }
 0x145   :  { %v100_v59 = vrot.slane %v99_v57, 2 }
 0x146   :  { %v122_v60 = vadd.f32 %v121_v58, %v120_v56 }
 0x147   :  { %v101_v61 = vadd.f32 %v100_v59, %v99_v57 }
 0x148   :  { %v123_v62 = vrot.slane %v122_v60, 1 }
 0x149   :  { %v102_v63 = vrot.slane %v101_v61, 1 }
 0x14a   :  { %v124_v0 = vadd.f32 %v123_v62, %v122_v60 }
 0x14b   :  { %v103_v1 = vadd.f32 %v102_v63, %v101_v61 }
 0x14c   :  { %153 = vrcp.f32 %v124_v0 }
 0x14d   :  { %155 = vrcp.f32 %v103_v1 }
 0x156   :  { %v154_v2 = vpop.eup %153 }
 0x157   :  { %v156_v3 = vpop.eup %155  ;;  %v126_v4 = vmul.f32 %v154_v2, %v150_v50 }
 0x158   :  { %v105_v5 = vmul.f32 %v156_v3, %v152_v51 }
 0x15a   :  { %106 = vst.msk [vmem:[%s217_s2] sm:$0xff] %vm86_vm1, %v105_v5 }
 0x15b   :  { %127 = vst.msk [vmem:[%s217_s2] sm:$0xff] %vm107_vm0, %v126_v4 }

</bundles_post_ra>
